<compile_context>
chip_gen: v7x
topology: tpu7x:2x2x1
jax: 0.10.0
libtpu: 0.0.40
codegen_flags: <defaults>
</compile_context>

<pallas_src>
import jax
import jax.numpy as jnp
from jax.experimental import pallas as pl
from jax.experimental.pallas import tpu as pltpu

# ---- config (matches EdgeModel.__init__ shapes) -----------------------------
NODE_C = 4                     # config['node_input_channels']
EDGE_C = 8                     # config['edge_input_channels']
IN_C = EDGE_C + 2 * NODE_C     # 16
H1 = 32                        # config['edge_model_hidden'][0]
H2 = 32                        # config['edge_model_hidden'][1]
OUT_C = 8                      # config['edge_output_channels']
NUM_GROUPS = 8                 # GroupNorm(8, C)  (use_groupnorm=True)
EPS = 1e-5                     # torch.nn.GroupNorm default eps

assert H1 % NUM_GROUPS == 0 and H2 % NUM_GROUPS == 0
assert H1 == H2  # one group-indicator matrix pair serves both GroupNorm layers


def _round_up(x, m):
    return ((x + m - 1) // m) * m


def _group_consts(C):
    # Group-indicator matrices for GroupNorm-as-matmul (built in the wrapper,
    # passed as constant operands -> resident in VMEM across grid steps).
    #   G   : [C, groups]  one-hot membership (broadcast groups -> channels)
    #   Gts : [groups, C]  membership pre-scaled by 1/group_size (mean reduce)
    gs = C // NUM_GROUPS
    ch = jnp.arange(C, dtype=jnp.int32)[:, None]
    gr = jnp.arange(NUM_GROUPS, dtype=jnp.int32)[None, :]
    G = (ch // gs == gr).astype(jnp.float32)
    Gts = G.T / float(gs)
    return G, Gts


def edge_mlp_kernel(x_ref,
                    w1_ref, b1_ref, g1_ref, be1_ref,
                    w2_ref, b2_ref, g2_ref, be2_ref,
                    w3_ref, b3_ref,
                    G_ref, Gts_ref,
                    out_ref):
    G = G_ref[...]        # [C, groups]
    Gts = Gts_ref[...]    # [groups, C], pre-scaled by 1/group_size

    def groupnorm_t(h, gamma, beta):
        # GroupNorm over the channel (sublane) dim of a [C, block] tile via
        # MXU matmuls with the group-indicator matrices. rsqrt runs on the
        # small [groups, block] tile (EUP), the broadcast runs on the MXU.
        mean_g = jnp.dot(Gts, h, preferred_element_type=jnp.float32)          # [g, block]
        d = h - jnp.dot(G, mean_g, preferred_element_type=jnp.float32)        # centered
        var_g = jnp.dot(Gts, d * d, preferred_element_type=jnp.float32)       # [g, block]
        inv_g = jax.lax.rsqrt(var_g + EPS)                                    # [g, block]
        scale = jnp.dot(G, inv_g, preferred_element_type=jnp.float32) * gamma # [C, block]
        return d * scale + beta

    # Linear 1: single K=16 matmul on the concatenated [IN_C, block] slab
    # (the torch.cat never materializes separately in the kernel).
    h = jnp.dot(w1_ref[...], x_ref[...], preferred_element_type=jnp.float32) + b1_ref[...]
    h = jnp.maximum(groupnorm_t(h, g1_ref[...], be1_ref[...]), 0.0)

    # Linear 2 + GroupNorm + ReLU
    h = jnp.dot(w2_ref[...], h, preferred_element_type=jnp.float32) + b2_ref[...]
    h = jnp.maximum(groupnorm_t(h, g2_ref[...], be2_ref[...]), 0.0)

    # Linear 3 (lane-dense [OUT_C, block] store)
    out_ref[...] = (jnp.dot(w3_ref[...], h, preferred_element_type=jnp.float32)
                    + b3_ref[...])


def edge_model_forward(src, dest, edge_attr, params, *, block_e=8192):
    """EdgeModel.forward(src, dest, edge_attr) -> [E, OUT_C] float32."""
    (w1, b1, g1, be1, w2, b2, g2, be2, w3, b3) = params
    E = src.shape[0]

    # Tile the edge dim: use the largest lane-aligned tile up to block_e and
    # balance the remainder across steps (minimizes dead padded lanes).
    # No forced splitting for small E — a single step avoids pure overhead on
    # 1-TC chips; large E naturally yields multiple "parallel" steps for v7x.
    e_min = _round_up(max(E, 1), 128)
    block_cap = max(128, _round_up(block_e, 128))
    n_steps = -(-e_min // block_cap)
    block = _round_up(-(-e_min // n_steps), 128)
    e_pad = n_steps * block
    grid = (n_steps,)

    f32 = lambda a: a.astype(jnp.float32)

    # Single producer for the activation slab: concat -> pad -> transpose.
    # allow_input_fusion lets XLA fold this into the pallas_call operand.
    x = jnp.concatenate([f32(src), f32(dest), f32(edge_attr)], axis=1)  # [E, IN_C]
    if x.shape[0] != e_pad:
        x = jnp.pad(x, ((0, e_pad - x.shape[0]), (0, 0)))
    x_t = x.T                                                           # [IN_C, e_pad]

    # Pre-transposed weights / per-channel params for the [C, E] layout.
    w1_t = f32(w1).T                                       # [H1, IN_C]
    b1_t, g1_t, be1_t = f32(b1).T, f32(g1).T, f32(be1).T   # [H1, 1]
    w2_t = f32(w2).T                                       # [H2, H1]
    b2_t, g2_t, be2_t = f32(b2).T, f32(g2).T, f32(be2).T   # [H2, 1]
    w3_t = f32(w3).T                                       # [OUT_C, H2]
    b3_t = f32(b3).T                                       # [OUT_C, 1]

    G, Gts = _group_consts(H1)                             # [H1, 8], [8, H1]

    full = lambda shape: pl.BlockSpec(shape, lambda i: (0, 0))
    col = lambda rows: pl.BlockSpec((rows, block), lambda i: (0, i))

    in_specs = [
        col(IN_C),                                                    # x slab
        full((H1, IN_C)), full((H1, 1)), full((H1, 1)), full((H1, 1)),
        full((H2, H1)), full((H2, 1)), full((H2, 1)), full((H2, 1)),
        full((OUT_C, H2)), full((OUT_C, 1)),
        full((H1, NUM_GROUPS)), full((NUM_GROUPS, H1)),
    ]
    # Only the activation slab benefits from producer fusion (its producer is
    # the concat/pad/transpose); weights are tiny constants.
    allow_fusion = [True] + [False] * (len(in_specs) - 1)

    out_t = pl.pallas_call(
        edge_mlp_kernel,
        out_shape=jax.ShapeDtypeStruct((OUT_C, e_pad), jnp.float32),
        grid_spec=pltpu.PrefetchScalarGridSpec(
            num_scalar_prefetch=0,
            grid=grid,
            in_specs=in_specs,
            out_specs=col(OUT_C),
        ),
        compiler_params=pltpu.CompilerParams(
            dimension_semantics=("parallel",),
            allow_input_fusion=allow_fusion,
        ),
    )(x_t,
      w1_t, b1_t, g1_t, be1_t,
      w2_t, b2_t, g2_t, be2_t,
      w3_t, b3_t,
      G, Gts)

    # Back to the PyTorch layout; drop padded edges.
    # TODO(synk): if the downstream consumer can take [OUT_C, E], skip this
    # transpose to save one more HBM round trip.
    return out_t[:, :E].T


def _reference(src, dest, edge_attr, params):
    # Pure-JAX reference of the same forward pass (for correctness check).
    (w1, b1, g1, be1, w2, b2, g2, be2, w3, b3) = params
    x = jnp.concatenate([src, dest, edge_attr], axis=1).astype(jnp.float32)

    def gn(h, gamma, beta):
        Erows, C = h.shape
        hg = h.reshape(Erows, NUM_GROUPS, C // NUM_GROUPS)
        mean = hg.mean(axis=-1, keepdims=True)
        var = hg.var(axis=-1, keepdims=True)
        hn = ((hg - mean) / jnp.sqrt(var + EPS)).reshape(Erows, C)
        return hn * gamma + beta

    h = x @ w1 + b1
    h = jnp.maximum(gn(h, g1, be1), 0.0)
    h = h @ w2 + b2
    h = jnp.maximum(gn(h, g2, be2), 0.0)
    return h @ w3 + b3


def init_params(key):
    ks = jax.random.split(key, 10)
    scale = 0.1
    w1 = jax.random.normal(ks[0], (IN_C, H1), jnp.float32) * scale
    b1 = jax.random.normal(ks[1], (1, H1), jnp.float32) * scale
    g1 = 1.0 + jax.random.normal(ks[2], (1, H1), jnp.float32) * scale
    be1 = jax.random.normal(ks[3], (1, H1), jnp.float32) * scale
    w2 = jax.random.normal(ks[4], (H1, H2), jnp.float32) * scale
    b2 = jax.random.normal(ks[5], (1, H2), jnp.float32) * scale
    g2 = 1.0 + jax.random.normal(ks[6], (1, H2), jnp.float32) * scale
    be2 = jax.random.normal(ks[7], (1, H2), jnp.float32) * scale
    w3 = jax.random.normal(ks[8], (H2, OUT_C), jnp.float32) * scale
    b3 = jax.random.normal(ks[9], (1, OUT_C), jnp.float32) * scale
    return (w1, b1, g1, be1, w2, b2, g2, be2, w3, b3)


if __name__ == "__main__":
    key = jax.random.PRNGKey(0)
    k_src, k_dst, k_edge, k_par = jax.random.split(key, 4)

    E = 200  # number of edges (acts as batch); not tile-aligned -> tests padding
    src = jax.random.normal(k_src, (E, NODE_C), jnp.float32)
    dest = jax.random.normal(k_dst, (E, NODE_C), jnp.float32)
    edge_attr = jax.random.normal(k_edge, (E, EDGE_C), jnp.float32)
    params = init_params(k_par)

    ref = _reference(src, dest, edge_attr, params)

    # Default path: single large tile (one grid step at this small E).
    out = edge_model_forward(src, dest, edge_attr, params)
    out = jax.block_until_ready(out)
    assert out.shape == (E, OUT_C)
    assert jnp.allclose(out, ref, atol=1e-4, rtol=1e-4), "mismatch vs JAX reference"

    # Multi-step path: small tile forces a 2-step grid (exercises tiling).
    out2 = edge_model_forward(src, dest, edge_attr, params, block_e=128)
    out2 = jax.block_until_ready(out2)
    assert jnp.allclose(out2, ref, atol=1e-4, rtol=1e-4), "mismatch (tiled) vs JAX reference"

    print("KERNEL_OK")
</pallas_src>

<mosaic_0001>
module attributes {stable_mosaic.version = 11 : i64} {
  func.func @edge_mlp_kernel(%arg0: i32, %arg1: memref<16x256xf32, #tpu.memory_space<vmem>>, %arg2: memref<32x16xf32, #tpu.memory_space<vmem>>, %arg3: memref<32x1xf32, #tpu.memory_space<vmem>>, %arg4: memref<32x1xf32, #tpu.memory_space<vmem>>, %arg5: memref<32x1xf32, #tpu.memory_space<vmem>>, %arg6: memref<32x32xf32, #tpu.memory_space<vmem>>, %arg7: memref<32x1xf32, #tpu.memory_space<vmem>>, %arg8: memref<32x1xf32, #tpu.memory_space<vmem>>, %arg9: memref<32x1xf32, #tpu.memory_space<vmem>>, %arg10: memref<8x32xf32, #tpu.memory_space<vmem>>, %arg11: memref<8x1xf32, #tpu.memory_space<vmem>>, %arg12: memref<32x8xf32, #tpu.memory_space<vmem>>, %arg13: memref<8x32xf32, #tpu.memory_space<vmem>>, %arg14: memref<8x256xf32, #tpu.memory_space<vmem>>) attributes {dimension_semantics = [#tpu.dimension_semantics<parallel>], iteration_bounds = array<i64: 1>, scalar_prefetch = 0 : i64, scratch_operands = 0 : i64, tpu.core_type = #tpu.core_type<tc>, window_params = [{transform_indices = @transform_0, window_bounds = array<i64: 16, 256>}, {pipeline_mode = #tpu.pipeline_mode<synchronous>, transform_indices = @transform_1, window_bounds = array<i64: 32, 16>}, {pipeline_mode = #tpu.pipeline_mode<synchronous>, transform_indices = @transform_2, window_bounds = array<i64: 32, 1>}, {pipeline_mode = #tpu.pipeline_mode<synchronous>, transform_indices = @transform_3, window_bounds = array<i64: 32, 1>}, {pipeline_mode = #tpu.pipeline_mode<synchronous>, transform_indices = @transform_4, window_bounds = array<i64: 32, 1>}, {pipeline_mode = #tpu.pipeline_mode<synchronous>, transform_indices = @transform_5, window_bounds = array<i64: 32, 32>}, {pipeline_mode = #tpu.pipeline_mode<synchronous>, transform_indices = @transform_6, window_bounds = array<i64: 32, 1>}, {pipeline_mode = #tpu.pipeline_mode<synchronous>, transform_indices = @transform_7, window_bounds = array<i64: 32, 1>}, {pipeline_mode = #tpu.pipeline_mode<synchronous>, transform_indices = @transform_8, window_bounds = array<i64: 32, 1>}, {pipeline_mode = #tpu.pipeline_mode<synchronous>, transform_indices = @transform_9, window_bounds = array<i64: 8, 32>}, {pipeline_mode = #tpu.pipeline_mode<synchronous>, transform_indices = @transform_10, window_bounds = array<i64: 8, 1>}, {pipeline_mode = #tpu.pipeline_mode<synchronous>, transform_indices = @transform_11, window_bounds = array<i64: 32, 8>}, {pipeline_mode = #tpu.pipeline_mode<synchronous>, transform_indices = @transform_12, window_bounds = array<i64: 8, 32>}, {transform_indices = @transform_13, window_bounds = array<i64: 8, 256>}]} {
    %c0 = arith.constant 0 : index
    %c0_0 = arith.constant 0 : index
    %0 = vector.load %arg12[%c0, %c0_0] : memref<32x8xf32, #tpu.memory_space<vmem>>, vector<32x8xf32>
    %c0_1 = arith.constant 0 : index
    %c0_2 = arith.constant 0 : index
    %1 = vector.load %arg13[%c0_1, %c0_2] : memref<8x32xf32, #tpu.memory_space<vmem>>, vector<8x32xf32>
    %c0_3 = arith.constant 0 : index
    %c0_4 = arith.constant 0 : index
    %2 = vector.load %arg2[%c0_3, %c0_4] : memref<32x16xf32, #tpu.memory_space<vmem>>, vector<32x16xf32>
    %c0_5 = arith.constant 0 : index
    %c0_6 = arith.constant 0 : index
    %3 = vector.load %arg1[%c0_5, %c0_6] : memref<16x256xf32, #tpu.memory_space<vmem>>, vector<16x256xf32>
    %cst = arith.constant dense<0.000000e+00> : vector<32x256xf32>
    %4 = tpu.matmul %2, %3, %cst {dimension_numbers = #tpu.dot_dimension_numbers<[1], [0], [0], [1], [0, 0, 1, 1], [], []>} : vector<32x16xf32>, vector<16x256xf32>, vector<32x256xf32> -> vector<32x256xf32>
    %c0_7 = arith.constant 0 : index
    %c0_8 = arith.constant 0 : index
    %5 = vector.load %arg3[%c0_7, %c0_8] : memref<32x1xf32, #tpu.memory_space<vmem>>, vector<32x1xf32>
    %6 = vector.broadcast %5 : vector<32x1xf32> to vector<32x256xf32>
    %7 = arith.addf %4, %6 : vector<32x256xf32>
    %c0_9 = arith.constant 0 : index
    %c0_10 = arith.constant 0 : index
    %8 = vector.load %arg4[%c0_9, %c0_10] : memref<32x1xf32, #tpu.memory_space<vmem>>, vector<32x1xf32>
    %c0_11 = arith.constant 0 : index
    %c0_12 = arith.constant 0 : index
    %9 = vector.load %arg5[%c0_11, %c0_12] : memref<32x1xf32, #tpu.memory_space<vmem>>, vector<32x1xf32>
    %cst_13 = arith.constant dense<0.000000e+00> : vector<8x256xf32>
    %10 = tpu.matmul %1, %7, %cst_13 {dimension_numbers = #tpu.dot_dimension_numbers<[1], [0], [0], [1], [0, 0, 1, 1], [], []>} : vector<8x32xf32>, vector<32x256xf32>, vector<8x256xf32> -> vector<8x256xf32>
    %cst_14 = arith.constant dense<0.000000e+00> : vector<32x256xf32>
    %11 = tpu.matmul %0, %10, %cst_14 {dimension_numbers = #tpu.dot_dimension_numbers<[1], [0], [0], [1], [0, 0, 1, 1], [], []>} : vector<32x8xf32>, vector<8x256xf32>, vector<32x256xf32> -> vector<32x256xf32>
    %12 = arith.subf %7, %11 : vector<32x256xf32>
    %13 = arith.mulf %12, %12 : vector<32x256xf32>
    %cst_15 = arith.constant dense<0.000000e+00> : vector<8x256xf32>
    %14 = tpu.matmul %1, %13, %cst_15 {dimension_numbers = #tpu.dot_dimension_numbers<[1], [0], [0], [1], [0, 0, 1, 1], [], []>} : vector<8x32xf32>, vector<32x256xf32>, vector<8x256xf32> -> vector<8x256xf32>
    %cst_16 = arith.constant 9.99999974E-6 : f32
    %15 = vector.broadcast %cst_16 : f32 to vector<8x256xf32>
    %16 = arith.addf %14, %15 : vector<8x256xf32>
    %17 = math.rsqrt %16 : vector<8x256xf32>
    %cst_17 = arith.constant dense<0.000000e+00> : vector<32x256xf32>
    %18 = tpu.matmul %0, %17, %cst_17 {dimension_numbers = #tpu.dot_dimension_numbers<[1], [0], [0], [1], [0, 0, 1, 1], [], []>} : vector<32x8xf32>, vector<8x256xf32>, vector<32x256xf32> -> vector<32x256xf32>
    %19 = vector.broadcast %8 : vector<32x1xf32> to vector<32x256xf32>
    %20 = arith.mulf %18, %19 : vector<32x256xf32>
    %21 = arith.mulf %12, %20 : vector<32x256xf32>
    %22 = vector.broadcast %9 : vector<32x1xf32> to vector<32x256xf32>
    %23 = arith.addf %21, %22 : vector<32x256xf32>
    %cst_18 = arith.constant 0.000000e+00 : f32
    %24 = vector.broadcast %cst_18 : f32 to vector<32x256xf32>
    %25 = arith.maximumf %23, %24 : vector<32x256xf32>
    %c0_19 = arith.constant 0 : index
    %c0_20 = arith.constant 0 : index
    %26 = vector.load %arg6[%c0_19, %c0_20] : memref<32x32xf32, #tpu.memory_space<vmem>>, vector<32x32xf32>
    %cst_21 = arith.constant dense<0.000000e+00> : vector<32x256xf32>
    %27 = tpu.matmul %26, %25, %cst_21 {dimension_numbers = #tpu.dot_dimension_numbers<[1], [0], [0], [1], [0, 0, 1, 1], [], []>} : vector<32x32xf32>, vector<32x256xf32>, vector<32x256xf32> -> vector<32x256xf32>
    %c0_22 = arith.constant 0 : index
    %c0_23 = arith.constant 0 : index
    %28 = vector.load %arg7[%c0_22, %c0_23] : memref<32x1xf32, #tpu.memory_space<vmem>>, vector<32x1xf32>
    %29 = vector.broadcast %28 : vector<32x1xf32> to vector<32x256xf32>
    %30 = arith.addf %27, %29 : vector<32x256xf32>
    %c0_24 = arith.constant 0 : index
    %c0_25 = arith.constant 0 : index
    %31 = vector.load %arg8[%c0_24, %c0_25] : memref<32x1xf32, #tpu.memory_space<vmem>>, vector<32x1xf32>
    %c0_26 = arith.constant 0 : index
    %c0_27 = arith.constant 0 : index
    %32 = vector.load %arg9[%c0_26, %c0_27] : memref<32x1xf32, #tpu.memory_space<vmem>>, vector<32x1xf32>
    %cst_28 = arith.constant dense<0.000000e+00> : vector<8x256xf32>
    %33 = tpu.matmul %1, %30, %cst_28 {dimension_numbers = #tpu.dot_dimension_numbers<[1], [0], [0], [1], [0, 0, 1, 1], [], []>} : vector<8x32xf32>, vector<32x256xf32>, vector<8x256xf32> -> vector<8x256xf32>
    %cst_29 = arith.constant dense<0.000000e+00> : vector<32x256xf32>
    %34 = tpu.matmul %0, %33, %cst_29 {dimension_numbers = #tpu.dot_dimension_numbers<[1], [0], [0], [1], [0, 0, 1, 1], [], []>} : vector<32x8xf32>, vector<8x256xf32>, vector<32x256xf32> -> vector<32x256xf32>
    %35 = arith.subf %30, %34 : vector<32x256xf32>
    %36 = arith.mulf %35, %35 : vector<32x256xf32>
    %cst_30 = arith.constant dense<0.000000e+00> : vector<8x256xf32>
    %37 = tpu.matmul %1, %36, %cst_30 {dimension_numbers = #tpu.dot_dimension_numbers<[1], [0], [0], [1], [0, 0, 1, 1], [], []>} : vector<8x32xf32>, vector<32x256xf32>, vector<8x256xf32> -> vector<8x256xf32>
    %cst_31 = arith.constant 9.99999974E-6 : f32
    %38 = vector.broadcast %cst_31 : f32 to vector<8x256xf32>
    %39 = arith.addf %37, %38 : vector<8x256xf32>
    %40 = math.rsqrt %39 : vector<8x256xf32>
    %cst_32 = arith.constant dense<0.000000e+00> : vector<32x256xf32>
    %41 = tpu.matmul %0, %40, %cst_32 {dimension_numbers = #tpu.dot_dimension_numbers<[1], [0], [0], [1], [0, 0, 1, 1], [], []>} : vector<32x8xf32>, vector<8x256xf32>, vector<32x256xf32> -> vector<32x256xf32>
    %42 = vector.broadcast %31 : vector<32x1xf32> to vector<32x256xf32>
    %43 = arith.mulf %41, %42 : vector<32x256xf32>
    %44 = arith.mulf %35, %43 : vector<32x256xf32>
    %45 = vector.broadcast %32 : vector<32x1xf32> to vector<32x256xf32>
    %46 = arith.addf %44, %45 : vector<32x256xf32>
    %cst_33 = arith.constant 0.000000e+00 : f32
    %47 = vector.broadcast %cst_33 : f32 to vector<32x256xf32>
    %48 = arith.maximumf %46, %47 : vector<32x256xf32>
    %c0_34 = arith.constant 0 : index
    %c0_35 = arith.constant 0 : index
    %49 = vector.load %arg10[%c0_34, %c0_35] : memref<8x32xf32, #tpu.memory_space<vmem>>, vector<8x32xf32>
    %cst_36 = arith.constant dense<0.000000e+00> : vector<8x256xf32>
    %50 = tpu.matmul %49, %48, %cst_36 {dimension_numbers = #tpu.dot_dimension_numbers<[1], [0], [0], [1], [0, 0, 1, 1], [], []>} : vector<8x32xf32>, vector<32x256xf32>, vector<8x256xf32> -> vector<8x256xf32>
    %c0_37 = arith.constant 0 : index
    %c0_38 = arith.constant 0 : index
    %51 = vector.load %arg11[%c0_37, %c0_38] : memref<8x1xf32, #tpu.memory_space<vmem>>, vector<8x1xf32>
    %52 = vector.broadcast %51 : vector<8x1xf32> to vector<8x256xf32>
    %53 = arith.addf %50, %52 : vector<8x256xf32>
    %c0_39 = arith.constant 0 : index
    %c0_40 = arith.constant 0 : index
    %54 = vector.load %arg14[%c0_39, %c0_40] : memref<8x256xf32, #tpu.memory_space<vmem>>, vector<8x256xf32>
    tpu.vector_store %arg14[%c0_39, %c0_40], %53 {strides = array<i32>} : memref<8x256xf32, #tpu.memory_space<vmem>>, vector<8x256xf32>,
    return
  }
  func.func @transform_0(%arg0: i32) -> (i32, i32) {
    %c0_i32 = arith.constant 0 : i32
    %c0_i32_0 = arith.constant 0 : i32
    return %c0_i32, %arg0 : i32, i32
  }
  func.func @transform_1(%arg0: i32) -> (i32, i32) {
    %c0_i32 = arith.constant 0 : i32
    %c0_i32_0 = arith.constant 0 : i32
    %c0_i32_1 = arith.constant 0 : i32
    return %c0_i32, %c0_i32_0 : i32, i32
  }
  func.func @transform_2(%arg0: i32) -> (i32, i32) {
    %c0_i32 = arith.constant 0 : i32
    %c0_i32_0 = arith.constant 0 : i32
    %c0_i32_1 = arith.constant 0 : i32
    return %c0_i32, %c0_i32_0 : i32, i32
  }
  func.func @transform_3(%arg0: i32) -> (i32, i32) {
    %c0_i32 = arith.constant 0 : i32
    %c0_i32_0 = arith.constant 0 : i32
    %c0_i32_1 = arith.constant 0 : i32
    return %c0_i32, %c0_i32_0 : i32, i32
  }
  func.func @transform_4(%arg0: i32) -> (i32, i32) {
    %c0_i32 = arith.constant 0 : i32
    %c0_i32_0 = arith.constant 0 : i32
    %c0_i32_1 = arith.constant 0 : i32
    return %c0_i32, %c0_i32_0 : i32, i32
  }
  func.func @transform_5(%arg0: i32) -> (i32, i32) {
    %c0_i32 = arith.constant 0 : i32
    %c0_i32_0 = arith.constant 0 : i32
    %c0_i32_1 = arith.constant 0 : i32
    return %c0_i32, %c0_i32_0 : i32, i32
  }
  func.func @transform_6(%arg0: i32) -> (i32, i32) {
    %c0_i32 = arith.constant 0 : i32
    %c0_i32_0 = arith.constant 0 : i32
    %c0_i32_1 = arith.constant 0 : i32
    return %c0_i32, %c0_i32_0 : i32, i32
  }
  func.func @transform_7(%arg0: i32) -> (i32, i32) {
    %c0_i32 = arith.constant 0 : i32
    %c0_i32_0 = arith.constant 0 : i32
    %c0_i32_1 = arith.constant 0 : i32
    return %c0_i32, %c0_i32_0 : i32, i32
  }
  func.func @transform_8(%arg0: i32) -> (i32, i32) {
    %c0_i32 = arith.constant 0 : i32
    %c0_i32_0 = arith.constant 0 : i32
    %c0_i32_1 = arith.constant 0 : i32
    return %c0_i32, %c0_i32_0 : i32, i32
  }
  func.func @transform_9(%arg0: i32) -> (i32, i32) {
    %c0_i32 = arith.constant 0 : i32
    %c0_i32_0 = arith.constant 0 : i32
    %c0_i32_1 = arith.constant 0 : i32
    return %c0_i32, %c0_i32_0 : i32, i32
  }
  func.func @transform_10(%arg0: i32) -> (i32, i32) {
    %c0_i32 = arith.constant 0 : i32
    %c0_i32_0 = arith.constant 0 : i32
    %c0_i32_1 = arith.constant 0 : i32
    return %c0_i32, %c0_i32_0 : i32, i32
  }
  func.func @transform_11(%arg0: i32) -> (i32, i32) {
    %c0_i32 = arith.constant 0 : i32
    %c0_i32_0 = arith.constant 0 : i32
    %c0_i32_1 = arith.constant 0 : i32
    return %c0_i32, %c0_i32_0 : i32, i32
  }
  func.func @transform_12(%arg0: i32) -> (i32, i32) {
    %c0_i32 = arith.constant 0 : i32
    %c0_i32_0 = arith.constant 0 : i32
    %c0_i32_1 = arith.constant 0 : i32
    return %c0_i32, %c0_i32_0 : i32, i32
  }
  func.func @transform_13(%arg0: i32) -> (i32, i32) {
    %c0_i32 = arith.constant 0 : i32
    %c0_i32_0 = arith.constant 0 : i32
    return %c0_i32, %arg0 : i32, i32
  }
}

</mosaic_0001>

<bundles_post_ra>
// kernel: tpu_custom_call.1
= control target key start
LH: loop header
LB: loop body
LE: loop exit
PB: predicated region body
PF: predicated region fallthrough
CT: control target
= control target key end

     0   :  { %v1381_v5 = vmov 0.0   ;;  %v1382_v6 = vmov 0   ;;  %vm82_vm0 = vcmask 130048   ;;  %s1728_s0 = inlined_call_operand.vmem [shape: f32[16,256], index: 0, kind: input, shape index: {}]   ;;  %s1729_s1 = inlined_call_operand.vmem [shape: f32[32,16], index: 1, kind: input, shape index: {}]   ;;  %s1730_s2 = inlined_call_operand.vmem [shape: f32[32,1], index: 2, kind: input, shape index: {}]   ;;  %s1731_s3 = inlined_call_operand.vmem [shape: f32[32,1], index: 3, kind: input, shape index: {}]   ;;  %s1732_s4 = inlined_call_operand.vmem [shape: f32[32,1], index: 4, kind: input, shape index: {}]   ;;  %s1733_s5 = inlined_call_operand.vmem [shape: f32[32,32], index: 5, kind: input, shape index: {}]   ;;  %s1734_s6 = inlined_call_operand.vmem [shape: f32[32,1], index: 6, kind: input, shape index: {}]   ;;  %s1735_s7 = inlined_call_operand.vmem [shape: f32[32,1], index: 7, kind: input, shape index: {}]   ;;  %s1736_s8 = inlined_call_operand.vmem [shape: f32[32,1], index: 8, kind: input, shape index: {}]   ;;  %s1737_s9 = inlined_call_operand.vmem [shape: f32[8,32], index: 9, kind: input, shape index: {}]   ;;  %s1738_s10 = inlined_call_operand.vmem [shape: f32[8,1], index: 10, kind: input, shape index: {}]   ;;  %s1739_s11 = inlined_call_operand.vmem [shape: f32[32,8], index: 11, kind: input, shape index: {}]   ;;  %s1740_s12 = inlined_call_operand.vmem [shape: f32[8,32], index: 12, kind: input, shape index: {}]   ;;  %s1741_s13 = inlined_call_operand.hbm [shape: f32[8,256], index: 13, kind: output, shape index: {}]  }
   0x1   :  { %v55_v0 = vld [vmem:[%s1728_s0 + $0x8] sm:$0xff]  ;;  %v57_v1 = vld [vmem:[%s1728_s0 + $0x18] sm:$0xff]  ;;  %v54_v2 = vld [vmem:[%s1728_s0] sm:$0xff]  ;;  %159 = vmatprep.mubr.f32.mxu0 %v1381_v5  ;;  %1347 = vset.pattern.permute.xlu0 %v1382_v6 }
   0x2   :  { %v1292_v3 = vpack.c.bf16 %v57_v1, %v55_v0  ;;  %v56_v4 = vld [vmem:[%s1728_s0 + $0x10] sm:$0xff]  ;;  %v58_v8 = vld [vmem:[%s1730_s2] sm:$0xff]  ;;  %1348 = vset.pattern.permute.xlu1 %v1382_v6  ;;  %260 = vmatprep.mubr.f32.mxu1 %v1381_v5  ;;  %v59_v11 = vld [vmem:[%s1730_s2 + $0x8] sm:$0xff] }
   0x3   :  { %v1294_v7 = vpack.c.bf16 %v56_v4, %v54_v2  ;;  %64 = vperm.xlu0 %1347, %v58_v8   ;;  %v60_v9 = vld [vmem:[%s1730_s2 + $0x10] sm:$0xff]  ;;  %v50_v10 = vld [vmem:[%s1729_s1] sm:$0xff]  ;;  %v61_v12 = vld [vmem:[%s1730_s2 + $0x18] sm:$0xff] }
   0x4   :  { %1293 = vmatprep.subr.bf16.mxu0 %v1292_v3  ;;  %74 = vperm.xlu1 %1348, %v60_v9   ;;  %v51_v13 = vld [vmem:[%s1729_s1 + $0x8] sm:$0xff]  ;;  %v184_v14 = vld [vmem:[%s1731_s3] sm:$0xff] }
   0x5   :  { %1295 = vmatpush1.bf16.msra.mxu0 %v1294_v7  ;;  %v185_v15 = vld [vmem:[%s1731_s3 + $0x8] sm:$0xff] }
   0x7   :  { %69 = vperm.xlu0 %1347, %v59_v11  }
   0x8   :  { %1263 = vmatmul.mubr.msk.f32.vlgmr.msra.gmra.mrb[0].mxu0 %vm82_vm0, %v50_v10  ;;  %79 = vperm.xlu1 %1348, %v61_v12  }
   0x9   :  { %165 = vmatprep.mubr.f32.mxu0 %v1381_v5 }
   0xb   :  { %549 = vperm.xlu0 %1347, %v184_v14  }
   0xc   :  { %1264 = vmatmul.mubr.msk.f32.gmra.mrb[2].mxu0 %vm82_vm0, %v51_v13 }
   0xd   :  { %18 = vsyncpa [#allocation3], 0  ;;  %171 = vmatprep.mubr.f32.mxu0 %v1381_v5  ;;  %v52_v16 = vld [vmem:[%s1729_s1 + $0x10] sm:$0xff]  ;;  %554 = vperm.xlu1 %1348, %v185_v15   ;;  %v187_v18 = vld [vmem:[%s1731_s3 + $0x18] sm:$0xff]  ;;  %vm192_vm1 = vcmask 261120   ;;  %vm267_vm2 = vcmask 64512  }
   0xe   :  { %v186_v17 = vld [vmem:[%s1731_s3 + $0x10] sm:$0xff]  ;;  %v53_v19 = vld [vmem:[%s1729_s1 + $0x18] sm:$0xff]  ;;  %v188_v20 = vld [vmem:[%s1732_s4] sm:$0xff]  ;;  %s1383_s22 = smov [#allocation2]  }
   0xf   :  { %559 = vperm.xlu0 %1347, %v186_v17   ;;  %v189_v21 = vld [vmem:[%s1732_s4 + $0x8] sm:$0xff]  ;;  %v190_v22 = vld [vmem:[%s1732_s4 + $0x10] sm:$0xff]  ;;  %v191_v23 = vld [vmem:[%s1732_s4 + $0x18] sm:$0xff]  ;;  %s1255_s23 = sshll.u32 %s1383_s22, 4  ;;  %s1256_s23 = int_to_ptr.vmem [resolvable:$true] %s1255_s23 }
  0x10   :  { %1265 = vmatmul.mubr.msk.f32.gmra.mrb[4].mxu0 %vm82_vm0, %v52_v16  ;;  %v623_v24 = vld [vmem:[%s1734_s6] sm:$0xff]  ;;  %v624_v25 = vld [vmem:[%s1734_s6 + $0x8] sm:$0xff]  ;;  %v625_v26 = vld [vmem:[%s1734_s6 + $0x10] sm:$0xff]  ;;  %s1357_s3 = scalar_lea.vmem %s1256_s23, 256  ;;  %p1362_p1 = scmp.lt.s32.totalorder %s1256_s23, %s1256_s23 }
  0x11   :  { %177 = vmatprep.mubr.f32.mxu0 %v1381_v5  ;;  %564 = vperm.xlu1 %1348, %v187_v18   ;;  %v626_v27 = vld [vmem:[%s1734_s6 + $0x18] sm:$0xff]  ;;  %v748_v28 = vld [vmem:[%s1735_s7] sm:$0xff]  ;;  %v749_v29 = vld [vmem:[%s1735_s7 + $0x8] sm:$0xff]  ;;  %p1358_p0 = scmp.ne.s32.totalorder %s1256_s23, %s1357_s3  ;;  %p1363_p2 = scmp.lt.s32.totalorder %s1357_s3, %s1357_s3 }
  0x12   :  { %v750_v30 = vld [vmem:[%s1735_s7 + $0x10] sm:$0xff]  ;;  %v751_v31 = vld [vmem:[%s1735_s7 + $0x18] sm:$0xff]  ;;  %v752_v32 = vld [vmem:[%s1736_s8] sm:$0xff] }
  0x13   :  { %585 = vperm.xlu0 %1347, %v188_v20   ;;  %v753_v33 = vld [vmem:[%s1736_s8 + $0x8] sm:$0xff]  ;;  %v754_v34 = vld [vmem:[%s1736_s8 + $0x10] sm:$0xff]  ;;  %v755_v35 = vld [vmem:[%s1736_s8 + $0x18] sm:$0xff]  ;;  %p1364_p3 = por %p1363_p2, %p1362_p1 }
  0x14   :  { %1266 = vmatmul.mubr.msk.f32.gmra.mrb[6].mxu0 %vm82_vm0, %v53_v19  ;;  %v1167_v36 = vld [vmem:[%s1738_s10] sm:$0xff]  ;;  %v1582_v1 = vld [vmem:[%s1739_s11 + $0x8] sm:$0xff]  ;;  %v1590_v2 = vld [vmem:[%s1739_s11 + $0x10] sm:$0xff] }
  0x15   :  { %590 = vperm.xlu1 %1348, %v189_v21   ;;  %449 = vmatprep.mubr.f32.mxu0 %v1381_v5  ;;  %v1566_v61 = vld [vmem:[%s1740_s12] sm:$0xff]  ;;  %v1598_v3 = vld [vmem:[%s1739_s11 + $0x18] sm:$0xff]  ;;  %p1365_p4 = pnand %p1364_p3, %p1358_p0 }
  0x16   :  { %v1574_v0 = vld [vmem:[%s1739_s11] sm:$0xff] }
  0x17   :  { %595 = vperm.xlu0 %1347, %v190_v22  }
  0x19   :  { %600 = vperm.xlu1 %1348, %v191_v23  }
  0x1b   :  { %629 = vperm.xlu0 %1347, %v623_v24  }
  0x1d   :  { %634 = vperm.xlu1 %1348, %v624_v25  }
  0x1f   :  { %639 = vperm.xlu0 %1347, %v625_v26  }
  0x21   :  { %644 = vperm.xlu1 %1348, %v626_v27  }
  0x23   :  { %1096 = vperm.xlu0 %1347, %v748_v28  }
  0x25   :  { %1101 = vperm.xlu1 %1348, %v749_v29  }
  0x27   :  { %1106 = vperm.xlu0 %1347, %v750_v30  }
  0x29   :  { %1111 = vperm.xlu1 %1348, %v751_v31  }
  0x2b   :  { %1132 = vperm.xlu0 %1347, %v752_v32  }
  0x2d   :  { %1137 = vperm.xlu1 %1348, %v753_v33  }
  0x2f   :  { %1142 = vperm.xlu0 %1347, %v754_v34  }
  0x31   :  { %1147 = vperm.xlu1 %1348, %v755_v35  }
  0x33   :  { %1170 = vperm.xlu0 %1347, %v1167_v36  }
  0x82   :  { %v65_v37 = vpop.permute.xlu0 %64 }
  0x83   :  { %v75_v44 = vpop.permute.xlu1 %74 }
  0x86   :  { %v70_v40 = vpop.permute.xlu0 %69 }
  0x87   :  { %v80_v52 = vpop.permute.xlu1 %79 }
  0xdb   :  { %v161_v38 = vpop.f32.mrb[0].mxu0 }
  0xdc   :  { %v163_v39 = vpop.f32.mrb[1].mxu0  ;;  %v162_v47 = vadd.f32 %v161_v38, %v65_v37 }
  0xdd   :  { %v164_v45 = vadd.f32 %v163_v39, %v65_v37  ;;  %v550_v39 = vpop.permute.xlu0 %549 }
  0xdf   :  { %v167_v41 = vpop.f32.mrb[2].mxu0 }
  0xe0   :  { %v168_v42 = vadd.f32 %v167_v41, %v70_v40  ;;  %v169_v43 = vpop.f32.mrb[3].mxu0 }
  0xe1   :  { %v170_v46 = vadd.f32 %v169_v43, %v70_v40  ;;  %v555_v40 = vpop.permute.xlu1 %554  ;;  %v560_v41 = vpop.permute.xlu0 %559 }
  0xe2   :  { %v1298_v51 = vpack.c.bf16 %v168_v42, %v162_v47 }
  0xe3   :  { %v173_v48 = vpop.f32.mrb[4].mxu0  ;;  %v1296_v49 = vpack.c.bf16 %v170_v46, %v164_v45 }
  0xe4   :  { %v175_v50 = vpop.f32.mrb[5].mxu0  ;;  %v174_v58 = vadd.f32 %v173_v48, %v75_v44 }
  0xe5   :  { %1297 = vmatprep.subr.bf16.mxu1 %v1296_v49  ;;  %v176_v56 = vadd.f32 %v175_v50, %v75_v44 }
  0xe6   :  { %1299 = vmatpush1.bf16.msra.mxu1 %v1298_v51 }
  0xe7   :  { %v179_v53 = vpop.f32.mrb[6].mxu0 }
  0xe8   :  { %v180_v54 = vadd.f32 %v179_v53, %v80_v52  ;;  %v181_v55 = vpop.f32.mrb[7].mxu0 }
  0xe9   :  { %v182_v57 = vadd.f32 %v181_v55, %v80_v52  ;;  %v586_v52 = vpop.permute.xlu0 %585 }
  0xea   :  { %v1302_v60 = vpack.c.bf16 %v180_v54, %v174_v58 }
  0xeb   :  { %v1300_v59 = vpack.c.bf16 %v182_v57, %v176_v56 }
  0xed   :  { %1301 = vmatprep.subr.bf16.mxu1 %v1300_v59 }
  0xee   :  { %1303 = vmatpush1.bf16.msra.mxu1 %v1302_v60 }
  0xf1   :  { %1267 = vmatmul.mubr.msk.f32.vlgmr.msra.gmra.mrb[0].mxu1 %vm192_vm1, %v1566_v61 }
  0xf2   :  { %344 = vmatprep.mubr.f32.mxu1 %v1381_v5 }
 0x1c4   :  { %v262_v62 = vpop.f32.mrb[0].mxu1 }
 0x1c5   :  { %v264_v63 = vpop.f32.mrb[1].mxu1 }
 0x1c6   :  { %280 = vmatprep.subr.mxu1 %v264_v63 }
 0x1c7   :  { %281 = vmatpush1.msra.mxu1 %v262_v62 }
 0x1c8   :  { %1268 = vmatmul.mubr.msk.f32.vlgmr.msra.gmra.mrb[2].mxu1 %vm267_vm2, %v1574_v0 }
 0x1c9   :  { %350 = vmatprep.mubr.f32.mxu1 %v1381_v5 }
 0x1cc   :  { %1269 = vmatmul.mubr.msk.f32.gmra.mrb[4].mxu1 %vm267_vm2, %v1582_v1 }
 0x1cd   :  { %356 = vmatprep.mubr.f32.mxu1 %v1381_v5 }
 0x1d0   :  { %1270 = vmatmul.mubr.msk.f32.gmra.mrb[6].mxu1 %vm267_vm2, %v1590_v2 }
 0x1d1   :  { %362 = vmatprep.mubr.f32.mxu1 %v1381_v5 }
 0x1d4   :  { %1271 = vmatmul.mubr.msk.f32.gmra.mrb[8].mxu1 %vm267_vm2, %v1598_v3 }
 0x1d5   :  { %723 = vmatprep.mubr.f32.mxu1 %v1381_v5 }
 0x29b   :  { %v346_v4 = vpop.f32.mrb[2].mxu1 }
 0x29c   :  { %v348_v6 = vpop.f32.mrb[3].mxu1  ;;  %v369_v9 = vsub.f32 %v162_v47, %v346_v4 }
 0x29d   :  { %v370_v7 = vsub.f32 %v164_v45, %v348_v6  ;;  %v565_v45 = vpop.permute.xlu1 %564 }
 0x29e   :  { %v377_v17 = vmul.f32 %v369_v9, %v369_v9 }
 0x29f   :  { %v352_v8 = vpop.f32.mrb[4].mxu1  ;;  %v378_v14 = vmul.f32 %v370_v7, %v370_v7 }
 0x2a0   :  { %v1603_v10 = vsub.f32 %v168_v42, %v352_v8  ;;  %v354_v11 = vpop.f32.mrb[5].mxu1 }
 0x2a1   :  { %v1605_v12 = vsub.f32 %v170_v46, %v354_v11 }
 0x2a2   :  { %v379_v13 = vmul.f32 %v1603_v10, %v1603_v10 }
 0x2a3   :  { %v380_v15 = vmul.f32 %v1605_v12, %v1605_v12  ;;  %v358_v16 = vpop.f32.mrb[6].mxu1 }
 0x2a4   :  { %v360_v18 = vpop.f32.mrb[7].mxu1  ;;  %v1306_v20 = vpack.c.bf16 %v379_v13, %v377_v17  ;;  %v373_v23 = vsub.f32 %v174_v58, %v358_v16 }
 0x2a5   :  { %v1304_v19 = vpack.c.bf16 %v380_v15, %v378_v14  ;;  %v1611_v21 = vsub.f32 %v176_v56, %v360_v18  ;;  %v591_v56 = vpop.permute.xlu1 %590  ;;  %v596_v18 = vpop.permute.xlu0 %595 }
 0x2a6   :  { %v381_v30 = vmul.f32 %v373_v23, %v373_v23 }
 0x2a7   :  { %v364_v22 = vpop.f32.mrb[8].mxu1  ;;  %1305 = vmatprep.subr.bf16.mxu0 %v1304_v19  ;;  %v382_v28 = vmul.f32 %v1611_v21, %v1611_v21 }
 0x2a8   :  { %v1613_v24 = vsub.f32 %v180_v54, %v364_v22  ;;  %v366_v25 = vpop.f32.mrb[9].mxu1  ;;  %1307 = vmatpush1.bf16.msra.mxu0 %v1306_v20 }
 0x2a9   :  { %v1615_v26 = vsub.f32 %v182_v57, %v366_v25  ;;  %v601_v25 = vpop.permute.xlu1 %600 }
 0x2aa   :  { %v383_v27 = vmul.f32 %v1613_v24, %v1613_v24 }
 0x2ab   :  { %v384_v29 = vmul.f32 %v1615_v26, %v1615_v26 }
 0x2ac   :  { %v1310_v32 = vpack.c.bf16 %v383_v27, %v381_v30 }
 0x2ad   :  { %v1308_v31 = vpack.c.bf16 %v384_v29, %v382_v28 }
 0x2af   :  { %1309 = vmatprep.subr.bf16.mxu0 %v1308_v31 }
 0x2b0   :  { %1311 = vmatpush1.bf16.msra.mxu0 %v1310_v32 }
 0x2b3   :  { %1272 = vmatmul.mubr.msk.f32.vlgmr.msra.gmra.mrb[8].mxu0 %vm192_vm1, %v1566_v61 }
 0x2b4   :  { %522 = vmatprep.mubr.f32.mxu0 %v1381_v5 }
 0x386   :  { %v451_v33 = vpop.f32.mrb[8].mxu0 }
 0x387   :  { %v452_v34 = vadd.f32 1e-05, %v451_v33  ;;  %v453_v35 = vpop.f32.mrb[9].mxu0 }
 0x388   :  { %v454_v36 = vadd.f32 1e-05, %v453_v35  ;;  %v621_v35 = vld [vmem:[%s1733_s5 + $0x10] sm:$0xff] }
 0x38a   :  { %1349 = vrsqrt.f32 %v454_v36  ;;  %v622_v36 = vld [vmem:[%s1733_s5 + $0x18] sm:$0xff] }
 0x38b   :  { %1351 = vrsqrt.f32 %v452_v34 }
 0x394   :  { %v1350_v37 = vpop.eup %1349 }
 0x395   :  { %v1352_v38 = vpop.eup %1351  ;;  %458 = vmatprep.subr.mxu0 %v1350_v37 }
 0x396   :  { %459 = vmatpush1.msra.mxu0 %v1352_v38 }
 0x397   :  { %1273 = vmatmul.mubr.msk.f32.vlgmr.msra.gmra.mrb[10].mxu0 %vm267_vm2, %v1574_v0 }
 0x398   :  { %528 = vmatprep.mubr.f32.mxu0 %v1381_v5 }
 0x39b   :  { %1274 = vmatmul.mubr.msk.f32.gmra.mrb[12].mxu0 %vm267_vm2, %v1582_v1 }
 0x39c   :  { %534 = vmatprep.mubr.f32.mxu0 %v1381_v5 }
 0x39f   :  { %1275 = vmatmul.mubr.msk.f32.gmra.mrb[14].mxu0 %vm267_vm2, %v1590_v2 }
 0x3a0   :  { %540 = vmatprep.mubr.f32.mxu0 %v1381_v5 }
 0x3a3   :  { %1276 = vmatmul.mubr.msk.f32.gmra.mrb[16].mxu0 %vm267_vm2, %v1598_v3 }
 0x3a4   :  { %820 = vmatprep.mubr.f32.mxu0 %v1381_v5 }
 0x46a   :  { %v524_v42 = vpop.f32.mrb[10].mxu0 }
 0x46b   :  { %v567_v43 = vmul.f32 %v550_v39, %v524_v42  ;;  %v526_v44 = vpop.f32.mrb[11].mxu0 }
 0x46c   :  { %v568_v46 = vmul.f32 %v550_v39, %v526_v44  ;;  %v635_v39 = vpop.permute.xlu1 %634 }
 0x46d   :  { %v575_v47 = vmul.f32 %v567_v43, %v369_v9 }
 0x46e   :  { %v576_v48 = vmul.f32 %v568_v46, %v370_v7  ;;  %v530_v49 = vpop.f32.mrb[12].mxu0 }
 0x46f   :  { %v569_v50 = vmul.f32 %v555_v40, %v530_v49  ;;  %v532_v51 = vpop.f32.mrb[13].mxu0  ;;  %v603_v54 = vadd.f32 %v586_v52, %v575_v47 }
 0x470   :  { %v570_v53 = vmul.f32 %v555_v40, %v532_v51  ;;  %v604_v57 = vadd.f32 %v586_v52, %v576_v48  ;;  %v645_v51 = vpop.permute.xlu1 %644 }
 0x471   :  { %v577_v55 = vmul.f32 %v569_v50, %v1603_v10  ;;  %v611_v8 = vmax.f32 %v603_v54, 0.0 }
 0x472   :  { %v578_v58 = vmul.f32 %v570_v53, %v1605_v12  ;;  %v536_v59 = vpop.f32.mrb[14].mxu0  ;;  %v612_v11 = vmax.f32 %v604_v57, 0.0 }
 0x473   :  { %v605_v60 = vadd.f32 %v591_v56, %v577_v55  ;;  %v571_v62 = vmul.f32 %v560_v41, %v536_v59  ;;  %v538_v63 = vpop.f32.mrb[15].mxu0 }
 0x474   :  { %v606_v4 = vadd.f32 %v591_v56, %v578_v58  ;;  %v572_v6 = vmul.f32 %v560_v41, %v538_v63  ;;  %v630_v41 = vpop.permute.xlu0 %629 }
 0x475   :  { %v613_v7 = vmax.f32 %v605_v60, 0.0  ;;  %v579_v9 = vmul.f32 %v571_v62, %v373_v23 }
 0x476   :  { %v614_v13 = vmax.f32 %v606_v4, 0.0  ;;  %v580_v14 = vmul.f32 %v572_v6, %v1611_v21  ;;  %v542_v15 = vpop.f32.mrb[16].mxu0 }
 0x477   :  { %v1314_v16 = vpack.c.bf16 %v613_v7, %v611_v8  ;;  %v573_v10 = vmul.f32 %v565_v45, %v542_v15  ;;  %v544_v17 = vpop.f32.mrb[17].mxu0  ;;  %v607_v20 = vadd.f32 %v596_v18, %v579_v9 }
 0x478   :  { %v574_v19 = vmul.f32 %v565_v45, %v544_v17  ;;  %v1312_v12 = vpack.c.bf16 %v614_v13, %v612_v11  ;;  %v608_v27 = vadd.f32 %v596_v18, %v580_v14  ;;  %v640_v53 = vpop.permute.xlu0 %639 }
 0x479   :  { %v581_v22 = vmul.f32 %v573_v10, %v1613_v24  ;;  %v615_v30 = vmax.f32 %v607_v20, 0.0  ;;  %v619_v24 = vld [vmem:[%s1733_s5] sm:$0xff] }
 0x47a   :  { %v582_v28 = vmul.f32 %v574_v19, %v1615_v26  ;;  %1313 = vmatprep.subr.bf16.mxu1 %v1312_v12  ;;  %v616_v31 = vmax.f32 %v608_v27, 0.0  ;;  %v620_v26 = vld [vmem:[%s1733_s5 + $0x8] sm:$0xff] }
 0x47b   :  { %v609_v23 = vadd.f32 %v601_v25, %v581_v22  ;;  %1315 = vmatpush1.bf16.msra.mxu1 %v1314_v16 }
 0x47c   :  { %v610_v29 = vadd.f32 %v601_v25, %v582_v28 }
 0x47d   :  { %v617_v21 = vmax.f32 %v609_v23, 0.0 }
 0x47e   :  { %v618_v32 = vmax.f32 %v610_v29, 0.0 }
 0x47f   :  { %v1318_v33 = vpack.c.bf16 %v617_v21, %v615_v30 }
 0x480   :  { %v1316_v34 = vpack.c.bf16 %v618_v32, %v616_v31 }
 0x482   :  { %1317 = vmatprep.subr.bf16.mxu1 %v1316_v34 }
 0x483   :  { %1319 = vmatpush1.bf16.msra.mxu1 %v1318_v33 }
 0x486   :  { %1277 = vmatmul.mubr.msk.f32.vlgmr.msra.gmra.mrb[10].mxu1 %vm192_vm1, %v619_v24 }
 0x487   :  { %729 = vmatprep.mubr.f32.mxu1 %v1381_v5 }
 0x48a   :  { %1278 = vmatmul.mubr.msk.f32.gmra.mrb[12].mxu1 %vm192_vm1, %v620_v26 }
 0x48b   :  { %735 = vmatprep.mubr.f32.mxu1 %v1381_v5 }
 0x48e   :  { %1279 = vmatmul.mubr.msk.f32.gmra.mrb[14].mxu1 %vm192_vm1, %v621_v35 }
 0x48f   :  { %741 = vmatprep.mubr.f32.mxu1 %v1381_v5 }
 0x492   :  { %1280 = vmatmul.mubr.msk.f32.gmra.mrb[16].mxu1 %vm192_vm1, %v622_v36 }
 0x493   :  { %996 = vmatprep.mubr.f32.mxu1 %v1381_v5 }
 0x559   :  { %v725_v37 = vpop.f32.mrb[10].mxu1 }
 0x55a   :  { %v727_v38 = vpop.f32.mrb[11].mxu1  ;;  %v726_v46 = vadd.f32 %v725_v37, %v630_v41 }
 0x55b   :  { %v728_v44 = vadd.f32 %v727_v38, %v630_v41 }
 0x55d   :  { %v731_v40 = vpop.f32.mrb[12].mxu1 }
 0x55e   :  { %v732_v42 = vadd.f32 %v731_v40, %v635_v39  ;;  %v733_v43 = vpop.f32.mrb[13].mxu1 }
 0x55f   :  { %v734_v45 = vadd.f32 %v733_v43, %v635_v39  ;;  %v1102_v39 = vpop.permute.xlu1 %1101 }
 0x560   :  { %v1322_v49 = vpack.c.bf16 %v732_v42, %v726_v46 }
 0x561   :  { %v1320_v47 = vpack.c.bf16 %v734_v45, %v728_v44  ;;  %v737_v48 = vpop.f32.mrb[14].mxu1 }
 0x562   :  { %v739_v50 = vpop.f32.mrb[15].mxu1  ;;  %v738_v58 = vadd.f32 %v737_v48, %v640_v53 }
 0x563   :  { %1321 = vmatprep.subr.bf16.mxu0 %v1320_v47  ;;  %v740_v56 = vadd.f32 %v739_v50, %v640_v53  ;;  %v1112_v43 = vpop.permute.xlu1 %1111 }
 0x564   :  { %1323 = vmatpush1.bf16.msra.mxu0 %v1322_v49 }
 0x565   :  { %v743_v52 = vpop.f32.mrb[16].mxu1 }
 0x566   :  { %v744_v54 = vadd.f32 %v743_v52, %v645_v51  ;;  %v745_v55 = vpop.f32.mrb[17].mxu1 }
 0x567   :  { %v746_v57 = vadd.f32 %v745_v55, %v645_v51  ;;  %v1138_v51 = vpop.permute.xlu1 %1137 }
 0x568   :  { %v1326_v60 = vpack.c.bf16 %v744_v54, %v738_v58 }
 0x569   :  { %v1324_v59 = vpack.c.bf16 %v746_v57, %v740_v56 }
 0x56b   :  { %1325 = vmatprep.subr.bf16.mxu0 %v1324_v59 }
 0x56c   :  { %1327 = vmatpush1.bf16.msra.mxu0 %v1326_v60 }
 0x56f   :  { %1281 = vmatmul.mubr.msk.f32.vlgmr.msra.gmra.mrb[18].mxu0 %vm192_vm1, %v1566_v61 }
 0x570   :  { %891 = vmatprep.mubr.f32.mxu0 %v1381_v5 }
 0x642   :  { %v822_v62 = vpop.f32.mrb[18].mxu0 }
 0x643   :  { %v824_v63 = vpop.f32.mrb[19].mxu0 }
 0x644   :  { %827 = vmatprep.subr.mxu0 %v824_v63 }
 0x645   :  { %828 = vmatpush1.msra.mxu0 %v822_v62 }
 0x646   :  { %1282 = vmatmul.mubr.msk.f32.vlgmr.msra.gmra.mrb[20].mxu0 %vm267_vm2, %v1574_v0 }
 0x647   :  { %897 = vmatprep.mubr.f32.mxu0 %v1381_v5 }
 0x64a   :  { %1283 = vmatmul.mubr.msk.f32.gmra.mrb[22].mxu0 %vm267_vm2, %v1582_v1 }
 0x64b   :  { %903 = vmatprep.mubr.f32.mxu0 %v1381_v5 }
 0x64e   :  { %1284 = vmatmul.mubr.msk.f32.gmra.mrb[24].mxu0 %vm267_vm2, %v1590_v2 }
 0x64f   :  { %909 = vmatprep.mubr.f32.mxu0 %v1381_v5 }
 0x652   :  { %1285 = vmatmul.mubr.msk.f32.gmra.mrb[26].mxu0 %vm267_vm2, %v1598_v3 }
 0x653   :  { %1240 = vmatprep.mubr.f32.mxu0 %v1381_v5 }
 0x719   :  { %v893_v4 = vpop.f32.mrb[20].mxu0 }
 0x71a   :  { %v895_v6 = vpop.f32.mrb[21].mxu0  ;;  %v916_v9 = vsub.f32 %v726_v46, %v893_v4 }
 0x71b   :  { %v917_v8 = vsub.f32 %v728_v44, %v895_v6 }
 0x71c   :  { %v924_v18 = vmul.f32 %v916_v9, %v916_v9 }
 0x71d   :  { %v899_v7 = vpop.f32.mrb[22].mxu0  ;;  %v925_v16 = vmul.f32 %v917_v8, %v917_v8 }
 0x71e   :  { %v918_v11 = vsub.f32 %v732_v42, %v899_v7  ;;  %v901_v13 = vpop.f32.mrb[23].mxu0 }
 0x71f   :  { %v1678_v14 = vsub.f32 %v734_v45, %v901_v13 }
 0x720   :  { %v926_v15 = vmul.f32 %v918_v11, %v918_v11 }
 0x721   :  { %v927_v10 = vmul.f32 %v1678_v14, %v1678_v14  ;;  %v905_v17 = vpop.f32.mrb[24].mxu0 }
 0x722   :  { %v907_v19 = vpop.f32.mrb[25].mxu0  ;;  %v1330_v20 = vpack.c.bf16 %v926_v15, %v924_v18  ;;  %v920_v27 = vsub.f32 %v738_v58, %v905_v17  ;;  %v1148_v17 = vpop.permute.xlu1 %1147 }
 0x723   :  { %v1328_v12 = vpack.c.bf16 %v927_v10, %v925_v16  ;;  %v1682_v22 = vsub.f32 %v740_v56, %v907_v19 }
 0x724   :  { %v928_v32 = vmul.f32 %v920_v27, %v920_v27 }
 0x725   :  { %v911_v25 = vpop.f32.mrb[26].mxu0  ;;  %1329 = vmatprep.subr.bf16.mxu1 %v1328_v12  ;;  %v929_v21 = vmul.f32 %v1682_v22, %v1682_v22 }
 0x726   :  { %v1684_v28 = vsub.f32 %v744_v54, %v911_v25  ;;  %v913_v23 = vpop.f32.mrb[27].mxu0  ;;  %1331 = vmatpush1.bf16.msra.mxu1 %v1330_v20 }
 0x727   :  { %v1686_v29 = vsub.f32 %v746_v57, %v913_v23 }
 0x728   :  { %v930_v30 = vmul.f32 %v1684_v28, %v1684_v28 }
 0x729   :  { %v931_v31 = vmul.f32 %v1686_v29, %v1686_v29 }
 0x72a   :  { %v1334_v34 = vpack.c.bf16 %v930_v30, %v928_v32 }
 0x72b   :  { %v1332_v33 = vpack.c.bf16 %v931_v31, %v929_v21 }
 0x72d   :  { %1333 = vmatprep.subr.bf16.mxu1 %v1332_v33 }
 0x72e   :  { %1335 = vmatpush1.bf16.msra.mxu1 %v1334_v34 }
 0x731   :  { %1286 = vmatmul.mubr.msk.f32.vlgmr.msra.gmra.mrb[18].mxu1 %vm192_vm1, %v1566_v61  ;;  %v1097_v61 = vpop.permute.xlu0 %1096 }
 0x732   :  { %1069 = vmatprep.mubr.f32.mxu1 %v1381_v5 }
 0x735   :  { %v1107_v40 = vpop.permute.xlu0 %1106 }
 0x739   :  { %v1133_v49 = vpop.permute.xlu0 %1132 }
 0x73d   :  { %v1143_v13 = vpop.permute.xlu0 %1142 }
 0x804   :  { %v998_v24 = vpop.f32.mrb[18].mxu1 }
 0x805   :  { %v999_v26 = vadd.f32 1e-05, %v998_v24  ;;  %v1000_v35 = vpop.f32.mrb[19].mxu1 }
 0x806   :  { %v1001_v36 = vadd.f32 1e-05, %v1000_v35 }
 0x808   :  { %1353 = vrsqrt.f32 %v1001_v36 }
 0x809   :  { %1355 = vrsqrt.f32 %v999_v26 }
 0x812   :  { %v1354_v37 = vpop.eup %1353 }
 0x813   :  { %v1356_v38 = vpop.eup %1355  ;;  %1005 = vmatprep.subr.mxu1 %v1354_v37 }
 0x814   :  { %1006 = vmatpush1.msra.mxu1 %v1356_v38 }
 0x815   :  { %1287 = vmatmul.mubr.msk.f32.vlgmr.msra.gmra.mrb[20].mxu1 %vm267_vm2, %v1574_v0 }
 0x816   :  { %1075 = vmatprep.mubr.f32.mxu1 %v1381_v5 }
 0x819   :  { %1288 = vmatmul.mubr.msk.f32.gmra.mrb[22].mxu1 %vm267_vm2, %v1582_v1 }
 0x81a   :  { %1081 = vmatprep.mubr.f32.mxu1 %v1381_v5 }
 0x81d   :  { %1289 = vmatmul.mubr.msk.f32.gmra.mrb[24].mxu1 %vm267_vm2, %v1590_v2 }
 0x81e   :  { %1087 = vmatprep.mubr.f32.mxu1 %v1381_v5 }
 0x821   :  { %1290 = vmatmul.mubr.msk.f32.gmra.mrb[26].mxu1 %vm267_vm2, %v1598_v3 }
 0x8e8   :  { %v1071_v41 = vpop.f32.mrb[20].mxu1 }
 0x8e9   :  { %v1114_v0 = vmul.f32 %v1097_v61, %v1071_v41  ;;  %v1073_v42 = vpop.f32.mrb[21].mxu1 }
 0x8ea   :  { %v1115_v44 = vmul.f32 %v1097_v61, %v1073_v42 }
 0x8eb   :  { %v1122_v45 = vmul.f32 %v1114_v0, %v916_v9 }
 0x8ec   :  { %v1123_v1 = vmul.f32 %v1115_v44, %v917_v8  ;;  %v1077_v46 = vpop.f32.mrb[22].mxu1 }
 0x8ed   :  { %v1116_v47 = vmul.f32 %v1102_v39, %v1077_v46  ;;  %v1079_v48 = vpop.f32.mrb[23].mxu1  ;;  %v1150_v50 = vadd.f32 %v1133_v49, %v1122_v45 }
 0x8ee   :  { %v1117_v2 = vmul.f32 %v1102_v39, %v1079_v48  ;;  %v1151_v52 = vadd.f32 %v1133_v49, %v1123_v1 }
 0x8ef   :  { %v1124_v5 = vmul.f32 %v1116_v47, %v918_v11  ;;  %v1158_v59 = vmax.f32 %v1150_v50, 0.0 }
 0x8f0   :  { %v1125_v3 = vmul.f32 %v1117_v2, %v1678_v14  ;;  %v1083_v53 = vpop.f32.mrb[24].mxu1  ;;  %v1159_v63 = vmax.f32 %v1151_v52, 0.0 }
 0x8f1   :  { %v1152_v54 = vadd.f32 %v1138_v51, %v1124_v5  ;;  %v1118_v55 = vmul.f32 %v1107_v40, %v1083_v53  ;;  %v1085_v56 = vpop.f32.mrb[25].mxu1 }
 0x8f2   :  { %v1153_v57 = vadd.f32 %v1138_v51, %v1125_v3  ;;  %v1119_v58 = vmul.f32 %v1107_v40, %v1085_v56 }
 0x8f3   :  { %v1160_v60 = vmax.f32 %v1152_v54, 0.0  ;;  %v1126_v62 = vmul.f32 %v1118_v55, %v920_v27 }
 0x8f4   :  { %v1161_v4 = vmax.f32 %v1153_v57, 0.0  ;;  %v1127_v6 = vmul.f32 %v1119_v58, %v1682_v22  ;;  %v1089_v8 = vpop.f32.mrb[26].mxu1 }
 0x8f5   :  { %v1338_v7 = vpack.c.bf16 %v1160_v60, %v1158_v59  ;;  %v1120_v9 = vmul.f32 %v1112_v43, %v1089_v8  ;;  %v1091_v11 = vpop.f32.mrb[27].mxu1  ;;  %v1154_v16 = vadd.f32 %v1143_v13, %v1126_v62 }
 0x8f6   :  { %v1121_v15 = vmul.f32 %v1112_v43, %v1091_v11  ;;  %v1336_v14 = vpack.c.bf16 %v1161_v4, %v1159_v63  ;;  %v1155_v18 = vadd.f32 %v1143_v13, %v1127_v6 }
 0x8f7   :  { %v1128_v10 = vmul.f32 %v1120_v9, %v1684_v28  ;;  %v1162_v25 = vmax.f32 %v1154_v16, 0.0  ;;  %v1166_v28 = vld [vmem:[%s1737_s9] sm:$0xff] }
 0x8f8   :  { %v1129_v19 = vmul.f32 %v1121_v15, %v1686_v29  ;;  %1337 = vmatprep.subr.bf16.mxu0 %v1336_v14  ;;  %v1163_v27 = vmax.f32 %v1155_v18, 0.0  ;;  %v1171_v29 = vpop.permute.xlu0 %1170 }
 0x8f9   :  { %v1156_v12 = vadd.f32 %v1148_v17, %v1128_v10  ;;  %1339 = vmatpush1.bf16.msra.mxu0 %v1338_v7 }
 0x8fa   :  { %v1157_v20 = vadd.f32 %v1148_v17, %v1129_v19 }
 0x8fb   :  { %v1164_v22 = vmax.f32 %v1156_v12, 0.0 }
 0x8fc   :  { %v1165_v23 = vmax.f32 %v1157_v20, 0.0 }
 0x8fd   :  { %v1342_v30 = vpack.c.bf16 %v1164_v22, %v1162_v25 }
 0x8fe   :  { %v1340_v21 = vpack.c.bf16 %v1165_v23, %v1163_v27 }
 0x900   :  { %1341 = vmatprep.subr.bf16.mxu0 %v1340_v21 }
 0x901   :  { %1343 = vmatpush1.bf16.msra.mxu0 %v1342_v30 }
 0x904   :  { %1291 = vmatmul.mubr.msk.f32.vlgmr.msra.gmra.mrb[28].mxu0 %vm192_vm1, %v1166_v28 }
 0x9d7   :  { %v1242_v31 = vpop.f32.mrb[28].mxu0 }
 0x9d8   :  { %v1243_v32 = vadd.f32 %v1242_v31, %v1171_v29  ;;  %v1244_v33 = vpop.f32.mrb[29].mxu0 }
 0x9d9   :  { %v1245_v34 = vadd.f32 %v1244_v33, %v1171_v29 }
 0x9da   :  { %1247 = vst [vmem:[#allocation2] sm:$0xff] %v1243_v32 }
 0x9db   :  { %1248 = vst [vmem:[#allocation2 + $0x8] sm:$0xff] %v1245_v34 }
 0x9dc   :  { %1368 = shalt.err (!%p1365_p4)
}
 0x9dd   :  { %s1369_s1 = scalar_lea.hbm %s1741_s13, 256 }
 0x9de   :  { %p1370_p5 = scmp.ne.s32.totalorder %s1741_s13, %s1369_s1  ;;  %p1373_p6 = scmp.lt.u32.totalorder %s1369_s1, %s1741_s13 }
 0x9e0   :  { %p1375_p7 = pnand %p1373_p6, %p1370_p5 }
 0x9e2   :  { %1378 = shalt.err (!%p1375_p7)
}
 0x9e3   :  { %1258 = dma.vmem_to_hbm [thread:$0]  %s1256_s23, 256, %s1741_s13, [#allocation3]  }
 0x9e4   :  { %1379 = dma.done.wait [#allocation3], 256  }
 0x9e5   :  { %1380 = vsyncadd [#allocation3], 4294967040 }
 0x9e6   :  { %1262 = vsyncpa [#allocation3], 1 }

</bundles_post_ra>
